<compile_context>
chip_gen: v7x
topology: tpu7x:2x2x1
jax: 0.10.0
libtpu: 0.0.40
codegen_flags: <defaults>
</compile_context>

<pallas_src>
import functools
from math import sqrt

import jax
import jax.numpy as jnp
from jax.experimental import pallas as pl
from jax.experimental.pallas import tpu as pltpu


def _round_up(n, m):
    return ((n + m - 1) // m) * m


# ----------------------------- Pallas kernel ------------------------------ #

def _fused_hypernet_kernel(x_ref, tw_ref, tb_ref, hw_ref, hb_ref, o_ref, *,
                           n_trunk, k_head):
    """One grid step computes one lane-dense tile of the concatenated head outputs.

    x_ref : (BP, DT)     zero-padded input embedding
    tw_ref: (L, DT, DT)  zero-padded trunk weights, (in, out) layout
    tb_ref: (L, 1, DT)   zero-padded trunk biases
    hw_ref: (KH, TN)     tile of the concatenated head weight slab (KH-row reduction)
    hb_ref: (1, TN)      tile of the concatenated head bias row
    o_ref : (BP, TN)     tile of the concatenated head outputs
    """
    h = x_ref[...]
    # Trunk MLP (Linear + ReLU per layer). n_trunk is a static Python int so this
    # unrolls; each matmul is tiny and recomputing it per output tile keeps the
    # grid axis fully parallel (no cross-iteration state).
    for l in range(n_trunk):
        h = jnp.dot(h, tw_ref[l], preferred_element_type=jnp.float32)
        h = jnp.maximum(h + tb_ref[l], 0.0)
    # Feed only the KH real encoding columns into the head matmul so the head
    # slab's reduction dim (and its HBM read) stays at round_up(num_encoding, 8).
    if k_head < h.shape[1]:
        h = h[:, :k_head]
    # All heads at once: one lane-dense MXU matmul + bias on the f32 accumulator.
    y = jnp.dot(h, hw_ref[...], preferred_element_type=jnp.float32) + hb_ref[...]
    o_ref[...] = y.astype(o_ref.dtype)


# --------------------------- parameter creation ---------------------------- #

def _default_linear_init(key, fan_in, fan_out, dtype=jnp.float32):
    """PyTorch nn.Linear default init: U(-1/sqrt(fan_in), 1/sqrt(fan_in))."""
    kw, kb = jax.random.split(key)
    bound = 1.0 / sqrt(fan_in)
    w = jax.random.uniform(kw, (fan_in, fan_out), dtype, -bound, bound)
    b = jax.random.uniform(kb, (1, fan_out), dtype, -bound, bound)
    return w, b


def _hyper_head_init(key, f_in, hypo_in, hypo_out, dtype=jnp.float32):
    """HyperHead init: kaiming_normal(fan_in, relu)/100 weights; uniform biases."""
    k1, k2, k3, k4 = jax.random.split(key, 4)
    std = sqrt(2.0 / f_in)
    # weight_linear: (f_in, hypo_in*hypo_out), bias ~ U(-1/hypo_in, 1/hypo_in)
    w_weight = (jax.random.normal(k1, (f_in, hypo_in * hypo_out), dtype) * std) / 100.0
    w_bias = jax.random.uniform(k2, (1, hypo_in * hypo_out), dtype,
                                -1.0 / hypo_in, 1.0 / hypo_in)
    # bias_linear: (f_in, hypo_out), bias ~ U(-1/f_in, 1/f_in)
    b_weight = (jax.random.normal(k3, (f_in, hypo_out), dtype) * std) / 100.0
    b_bias = jax.random.uniform(k4, (1, hypo_out), dtype, -1.0 / f_in, 1.0 / f_in)
    return dict(hypo_in=hypo_in, hypo_out=hypo_out,
                w_weight=w_weight, w_bias=w_bias,
                b_weight=b_weight, b_bias=b_bias)


def make_hypernetwork_params(key, input_dim, hidden, hypo_linear_shapes,
                             dtype=jnp.float32):
    """hypo_linear_shapes: list of (f_in, f_out) for each nn.Linear in the hypo net."""
    params = {"trunk": [], "heads": []}
    dims = [input_dim] + list(hidden)
    for d_in, d_out in zip(dims[:-1], dims[1:]):
        key, sub = jax.random.split(key)
        params["trunk"].append(_default_linear_init(sub, d_in, d_out, dtype))
    num_encoding = hidden[-1] if hidden else input_dim
    for f_in, f_out in hypo_linear_shapes:
        key, sub = jax.random.split(key)
        # HyperHead(num_encoding, hypo_in=f_in, hypo_out=f_out)
        params["heads"].append(_hyper_head_init(sub, num_encoding, f_in, f_out, dtype))
    return params


# --------------------------- packing for the kernel ------------------------ #

def _vmem_capacity_bytes():
    # Conservative fallback = v7x per-TensorCore VMEM (smallest of v5e/v6e/v7x).
    try:
        return int(pltpu.get_tpu_info().vmem_capacity_bytes)
    except Exception:
        return 64 << 20


def _choose_tile_lanes(n_cols, k_head, max_tile_lanes, bp_estimate=256):
    """Pick the head-output tile width TN (multiple of 128 lanes).

    Sized so the double-buffered streamed tiles (hw + hb + out) stay within half
    of VMEM on whatever chip we're on; capped by max_tile_lanes.
    """
    cols128 = pl.cdiv(n_cols, 128)
    budget = _vmem_capacity_bytes() // 2
    # bytes per 128-lane column group, double-buffered: hw rows + bias row + out rows
    per_col_bytes = 2 * 4 * 128 * (k_head + 1 + bp_estimate)
    fit_cols = max(1, budget // per_col_bytes)
    tile_cols = max(1, min(cols128, fit_cols, max(1, max_tile_lanes // 128)))
    # Large slabs: keep >=2 parallel grid steps so v7x's two TensorCores both work
    # (harmless on v5e/v6e -- two big tiles are still well over 85% of roofline).
    if cols128 >= 64 and tile_cols >= cols128:
        tile_cols = pl.cdiv(cols128, 2)
    TN = 128 * tile_cols
    N_pad = _round_up(n_cols, TN)
    return TN, N_pad


def pack_hypernetwork_params(params, input_dim, hidden, max_tile_lanes=8192):
    """Zero-pad trunk layers to a common small (DT, DT) square (DT = 8-aligned,
    NOT 128) and concatenate all head projections into one lane-dense
    (KH, N_pad) slab with the reduction dim KH = round_up(num_encoding, 8)."""
    dtype = jnp.float32
    # TODO(synk): hidden == [] (no trunk layers) path not implemented in the fused kernel.
    assert len(hidden) >= 1, "fused kernel expects at least one trunk layer"
    dims = [input_dim] + list(hidden)
    DT = _round_up(max(dims), 8)          # trunk pad: sublane-aligned only
    L = len(params["trunk"])

    tw = jnp.zeros((L, DT, DT), dtype)
    tb = jnp.zeros((L, 1, DT), dtype)
    for l, (w, b) in enumerate(params["trunk"]):
        d_in, d_out = w.shape
        tw = tw.at[l, :d_in, :d_out].set(w)
        tb = tb.at[l, 0, :d_out].set(b[0])

    num_encoding = hidden[-1]
    KH = _round_up(num_encoding, 8)       # head-slab reduction dim (was 128 before)

    w_cols, b_cols, meta = [], [], []
    off = 0
    for head in params["heads"]:
        f_in, f_out = head["hypo_in"], head["hypo_out"]
        w_cols += [head["w_weight"], head["b_weight"]]
        b_cols += [head["w_bias"], head["b_bias"]]
        meta.append((off, off + f_in * f_out, f_in, f_out))   # (w_off, b_off, f_in, f_out)
        off += f_in * f_out + f_out
    n_cols = off
    hw = jnp.concatenate(w_cols, axis=1)          # (num_encoding, n_cols)
    hb = jnp.concatenate(b_cols, axis=1)          # (1, n_cols)

    TN, N_pad = _choose_tile_lanes(n_cols, KH, max_tile_lanes)
    hw_pad = jnp.zeros((KH, N_pad), dtype).at[:num_encoding, :n_cols].set(hw)
    hb_pad = jnp.zeros((1, N_pad), dtype).at[:, :n_cols].set(hb)

    return dict(DT=DT, KH=KH, n_trunk=L, TN=TN, N_pad=N_pad,
                tw=tw, tb=tb, hw=hw_pad, hb=hb_pad, head_meta=tuple(meta))


# ------------------------------- forward ----------------------------------- #

def hypernetwork_forward(packed, x):
    """Mirrors HyperNetwork.forward: trunk (Linear+ReLU)*, then per-head
    (weight, bias) generation.  Returns (list_of_weights, list_of_biases)."""
    B, input_dim = x.shape
    BP = _round_up(max(B, 8), 8)                    # pad batch to f32 sublane count
    DT, L, KH = packed["DT"], packed["n_trunk"], packed["KH"]
    TN, N_pad = packed["TN"], packed["N_pad"]

    x_pad = jnp.zeros((BP, DT), jnp.float32).at[:B, :input_dim].set(x)

    grid_n = N_pad // TN
    flops = grid_n * (2 * BP * DT * DT * L) + 2 * BP * KH * N_pad
    bytes_accessed = 4 * (x_pad.size + packed["tw"].size + packed["tb"].size
                          + packed["hw"].size + packed["hb"].size + BP * N_pad)

    # Explicit VMEM budget (review: v7x has only 64 MiB physical / 32 MiB default
    # scoped).  Estimate: double-buffered streamed tiles + constants + temporaries,
    # with 2x headroom, clamped to [32 MiB, 64 MiB] so it is <= physical everywhere.
    # NOTE: x/tw/tb have constant block indices so the pipeliner does not re-fetch
    # them across grid steps; at realistic sizes they could also be single-buffered.
    vmem_est = 4 * (2 * (KH * TN + TN + BP * TN)
                    + 2 * (BP * DT + L * DT * DT + L * DT)
                    + BP * max(DT, TN))
    vmem_limit = int(min(64 << 20, max(32 << 20, 2 * vmem_est)))

    kernel = functools.partial(_fused_hypernet_kernel, n_trunk=L, k_head=KH)
    out = pl.pallas_call(
        kernel,
        out_shape=jax.ShapeDtypeStruct((BP, N_pad), jnp.float32),
        grid=(grid_n,),
        in_specs=[
            pl.BlockSpec((BP, DT), lambda j: (0, 0)),
            pl.BlockSpec((L, DT, DT), lambda j: (0, 0, 0)),
            pl.BlockSpec((L, 1, DT), lambda j: (0, 0, 0)),
            pl.BlockSpec((KH, TN), lambda j: (0, j)),
            pl.BlockSpec((1, TN), lambda j: (0, j)),
        ],
        out_specs=pl.BlockSpec((BP, TN), lambda j: (0, j)),
        compiler_params=pltpu.CompilerParams(
            dimension_semantics=("parallel",),
            vmem_limit_bytes=vmem_limit),
        cost_estimate=pl.CostEstimate(
            flops=flops, transcendentals=0, bytes_accessed=bytes_accessed),
    )(x_pad, packed["tw"], packed["tb"], packed["hw"], packed["hb"])

    out = out[:B]
    weights, biases = [], []
    for (w_off, b_off, f_in, f_out) in packed["head_meta"]:
        w_flat = out[:, w_off:w_off + f_in * f_out]
        # reshape(batch, hypo_out, hypo_in): identical row-major element order to torch's .reshape
        weights.append(w_flat.reshape(B, f_out, f_in))
        biases.append(out[:, b_off:b_off + f_out])
    return weights, biases


# -------------------------- pure-JAX reference ------------------------------ #

def reference_forward(params, x):
    h = x
    for w, b in params["trunk"]:
        h = jnp.maximum(h @ w + b, 0.0)
    weights, biases = [], []
    for head in params["heads"]:
        w_flat = h @ head["w_weight"] + head["w_bias"]
        weights.append(w_flat.reshape(x.shape[0], head["hypo_out"], head["hypo_in"]))
        biases.append(h @ head["b_weight"] + head["b_bias"])
    return weights, biases


# --------------------------------- main ------------------------------------ #

if __name__ == "__main__":
    key = jax.random.PRNGKey(0)
    batch = 2
    input_dim = 32            # embedding feature size into the hypernetwork
    hidden = [32, 32]         # trunk MLP hidden sizes
    # hypo_network = SIREN-like Sequential of Linears: (f_in, f_out) per layer
    hypo_linear_shapes = [(2, 32), (32, 32), (32, 1)]

    key, pkey, xkey = jax.random.split(key, 3)
    params = make_hypernetwork_params(pkey, input_dim, hidden, hypo_linear_shapes)
    packed = pack_hypernetwork_params(params, input_dim, hidden)
    x = jax.random.normal(xkey, (batch, input_dim), jnp.float32)

    weights, biases = hypernetwork_forward(packed, x)
    jax.block_until_ready(weights)
    jax.block_until_ready(biases)

    # shape + numerical check against a pure-JAX reference of the PyTorch module
    ref_w, ref_b = reference_forward(params, x)
    for (f_in, f_out), w, b, rw, rb in zip(hypo_linear_shapes, weights, biases,
                                           ref_w, ref_b):
        assert w.shape == (batch, f_out, f_in), w.shape
        assert b.shape == (batch, f_out), b.shape
        assert jnp.allclose(w, rw, atol=1e-5, rtol=1e-5), "head weight mismatch"
        assert jnp.allclose(b, rb, atol=1e-5, rtol=1e-5), "head bias mismatch"

    print("KERNEL_OK")
</pallas_src>

<mosaic_0001>
module attributes {stable_mosaic.version = 11 : i64} {
  func.func @_fused_hypernet_kernel(%arg0: i32, %arg1: memref<8x32xf32, #tpu.memory_space<vmem>>, %arg2: memref<2x32x32xf32, #tpu.memory_space<vmem>>, %arg3: memref<2x1x32xf32, #tpu.memory_space<vmem>>, %arg4: memref<32x1280xf32, #tpu.memory_space<vmem>>, %arg5: memref<1x1280xf32, #tpu.memory_space<vmem>>, %arg6: memref<8x1280xf32, #tpu.memory_space<vmem>>) attributes {dimension_semantics = [#tpu.dimension_semantics<parallel>], iteration_bounds = array<i64: 1>, scalar_prefetch = 0 : i64, scratch_operands = 0 : i64, tpu.core_type = #tpu.core_type<tc>, window_params = [{pipeline_mode = #tpu.pipeline_mode<synchronous>, transform_indices = @transform_0, window_bounds = array<i64: 8, 32>}, {pipeline_mode = #tpu.pipeline_mode<synchronous>, transform_indices = @transform_1, window_bounds = array<i64: 2, 32, 32>}, {pipeline_mode = #tpu.pipeline_mode<synchronous>, transform_indices = @transform_2, window_bounds = array<i64: 2, 1, 32>}, {transform_indices = @transform_3, window_bounds = array<i64: 32, 1280>}, {transform_indices = @transform_4, window_bounds = array<i64: 1, 1280>}, {transform_indices = @transform_5, window_bounds = array<i64: 8, 1280>}]} {
    %c0 = arith.constant 0 : index
    %c0_0 = arith.constant 0 : index
    %0 = vector.load %arg1[%c0, %c0_0] : memref<8x32xf32, #tpu.memory_space<vmem>>, vector<8x32xf32>
    %c0_1 = arith.constant 0 : index
    %c0_2 = arith.constant 0 : index
    %c0_3 = arith.constant 0 : index
    %1 = vector.load %arg2[%c0_1, %c0_2, %c0_3] : memref<2x32x32xf32, #tpu.memory_space<vmem>>, vector<1x32x32xf32>
    %2 = vector.shape_cast %1 : vector<1x32x32xf32> to vector<32x32xf32>
    %cst = arith.constant dense<0.000000e+00> : vector<8x32xf32>
    %3 = tpu.matmul %0, %2, %cst {dimension_numbers = #tpu.dot_dimension_numbers<[1], [0], [0], [1], [0, 0, 1, 1], [], []>} : vector<8x32xf32>, vector<32x32xf32>, vector<8x32xf32> -> vector<8x32xf32>
    %c0_4 = arith.constant 0 : index
    %c0_5 = arith.constant 0 : index
    %c0_6 = arith.constant 0 : index
    %4 = vector.load %arg3[%c0_4, %c0_5, %c0_6] : memref<2x1x32xf32, #tpu.memory_space<vmem>>, vector<1x1x32xf32>
    %5 = vector.shape_cast %4 : vector<1x1x32xf32> to vector<1x32xf32>
    %6 = vector.broadcast %5 : vector<1x32xf32> to vector<8x32xf32>
    %7 = arith.addf %3, %6 : vector<8x32xf32>
    %cst_7 = arith.constant 0.000000e+00 : f32
    %8 = vector.broadcast %cst_7 : f32 to vector<8x32xf32>
    %9 = arith.maximumf %7, %8 : vector<8x32xf32>
    %c1 = arith.constant 1 : index
    %c0_8 = arith.constant 0 : index
    %c0_9 = arith.constant 0 : index
    %10 = vector.load %arg2[%c1, %c0_8, %c0_9] : memref<2x32x32xf32, #tpu.memory_space<vmem>>, vector<1x32x32xf32>
    %11 = vector.shape_cast %10 : vector<1x32x32xf32> to vector<32x32xf32>
    %cst_10 = arith.constant dense<0.000000e+00> : vector<8x32xf32>
    %12 = tpu.matmul %9, %11, %cst_10 {dimension_numbers = #tpu.dot_dimension_numbers<[1], [0], [0], [1], [0, 0, 1, 1], [], []>} : vector<8x32xf32>, vector<32x32xf32>, vector<8x32xf32> -> vector<8x32xf32>
    %c1_11 = arith.constant 1 : index
    %c0_12 = arith.constant 0 : index
    %c0_13 = arith.constant 0 : index
    %13 = vector.load %arg3[%c1_11, %c0_12, %c0_13] : memref<2x1x32xf32, #tpu.memory_space<vmem>>, vector<1x1x32xf32>
    %14 = vector.shape_cast %13 : vector<1x1x32xf32> to vector<1x32xf32>
    %15 = vector.broadcast %14 : vector<1x32xf32> to vector<8x32xf32>
    %16 = arith.addf %12, %15 : vector<8x32xf32>
    %cst_14 = arith.constant 0.000000e+00 : f32
    %17 = vector.broadcast %cst_14 : f32 to vector<8x32xf32>
    %18 = arith.maximumf %16, %17 : vector<8x32xf32>
    %c0_15 = arith.constant 0 : index
    %c0_16 = arith.constant 0 : index
    %19 = vector.load %arg4[%c0_15, %c0_16] : memref<32x1280xf32, #tpu.memory_space<vmem>>, vector<32x1280xf32>
    %cst_17 = arith.constant dense<0.000000e+00> : vector<8x1280xf32>
    %20 = tpu.matmul %18, %19, %cst_17 {dimension_numbers = #tpu.dot_dimension_numbers<[1], [0], [0], [1], [0, 0, 1, 1], [], []>} : vector<8x32xf32>, vector<32x1280xf32>, vector<8x1280xf32> -> vector<8x1280xf32>
    %c0_18 = arith.constant 0 : index
    %c0_19 = arith.constant 0 : index
    %21 = vector.load %arg5[%c0_18, %c0_19] : memref<1x1280xf32, #tpu.memory_space<vmem>>, vector<1x1280xf32>
    %22 = vector.broadcast %21 : vector<1x1280xf32> to vector<8x1280xf32>
    %23 = arith.addf %20, %22 : vector<8x1280xf32>
    %c0_20 = arith.constant 0 : index
    %c0_21 = arith.constant 0 : index
    %24 = vector.load %arg6[%c0_20, %c0_21] : memref<8x1280xf32, #tpu.memory_space<vmem>>, vector<8x1280xf32>
    tpu.vector_store %arg6[%c0_20, %c0_21], %23 {strides = array<i32>} : memref<8x1280xf32, #tpu.memory_space<vmem>>, vector<8x1280xf32>,
    return
  }
  func.func @transform_0(%arg0: i32) -> (i32, i32) {
    %c0_i32 = arith.constant 0 : i32
    %c0_i32_0 = arith.constant 0 : i32
    %c0_i32_1 = arith.constant 0 : i32
    return %c0_i32, %c0_i32_0 : i32, i32
  }
  func.func @transform_1(%arg0: i32) -> (i32, i32, i32) {
    %c0_i32 = arith.constant 0 : i32
    %c0_i32_0 = arith.constant 0 : i32
    %c0_i32_1 = arith.constant 0 : i32
    %c0_i32_2 = arith.constant 0 : i32
    return %c0_i32, %c0_i32_0, %c0_i32_1 : i32, i32, i32
  }
  func.func @transform_2(%arg0: i32) -> (i32, i32, i32) {
    %c0_i32 = arith.constant 0 : i32
    %c0_i32_0 = arith.constant 0 : i32
    %c0_i32_1 = arith.constant 0 : i32
    %c0_i32_2 = arith.constant 0 : i32
    return %c0_i32, %c0_i32_0, %c0_i32_1 : i32, i32, i32
  }
  func.func @transform_3(%arg0: i32) -> (i32, i32) {
    %c0_i32 = arith.constant 0 : i32
    %c0_i32_0 = arith.constant 0 : i32
    return %c0_i32, %arg0 : i32, i32
  }
  func.func @transform_4(%arg0: i32) -> (i32, i32) {
    %c0_i32 = arith.constant 0 : i32
    %c0_i32_0 = arith.constant 0 : i32
    return %c0_i32, %arg0 : i32, i32
  }
  func.func @transform_5(%arg0: i32) -> (i32, i32) {
    %c0_i32 = arith.constant 0 : i32
    %c0_i32_0 = arith.constant 0 : i32
    return %c0_i32, %arg0 : i32, i32
  }
}

</mosaic_0001>

<bundles_post_ra>
// kernel: tpu_custom_call.1
= control target key start
LH: loop header
LB: loop body
LE: loop exit
PB: predicated region body
PF: predicated region fallthrough
CT: control target
= control target key end

     0   :  { %10 = vsyncpa [#allocation3], 0  ;;  %s1026_s0 = inlined_call_operand.hbm [shape: f32[8,32], index: 0, kind: input, shape index: {}]   ;;  %s1027_s1 = inlined_call_operand.hbm [shape: f32[2,32,32], index: 1, kind: input, shape index: {}]   ;;  %s1028_s2 = inlined_call_operand.vmem [shape: f32[2,1,32], index: 2, kind: input, shape index: {}]   ;;  %s1029_s3 = inlined_call_operand.hbm [shape: f32[32,1280], index: 3, kind: input, shape index: {}]   ;;  %s1030_s4 = inlined_call_operand.vmem [shape: f32[1,1280], index: 4, kind: input, shape index: {}]   ;;  %s1031_s5 = inlined_call_operand.hbm [shape: f32[8,1280], index: 5, kind: output, shape index: {}]  }
   0x1   :  { %11 = vsyncpa [#allocation6], 0 }
   0x2   :  { %12 = vsyncpa [#allocation4], 0  ;;  %s911_s18 = smov [#allocation5]   ;;  %s817_s22 = scalar_lea.hbm %s1027_s1, 1024 }
   0x3   :  { %s28_s19 = sshll.u32 %s911_s18, 4  ;;  %p818_p0 = scmp.ne.s32.totalorder %s1027_s1, %s817_s22  ;;  %s29_s19 = int_to_ptr.vmem [resolvable:$true] %s28_s19 }
   0x4   :  { %p821_p1 = scmp.lt.u32.totalorder %s817_s22, %s1027_s1 }
   0x6   :  { %p823_p2 = pnand %p821_p1, %p818_p0 }
   0x8   :  { %826 = shalt.err (!%p823_p2)
}
   0x9   :  { %s827_s27 = scalar_lea.vmem %s29_s19, 1024  ;;  %p832_p4 = scmp.lt.s32.totalorder %s29_s19, %s29_s19 }
   0xa   :  { %p828_p3 = scmp.ne.s32.totalorder %s29_s19, %s827_s27  ;;  %p833_p5 = scmp.lt.s32.totalorder %s827_s27, %s827_s27 }
   0xc   :  { %p834_p6 = por %p833_p5, %p832_p4 }
   0xe   :  { %p835_p7 = pnand %p834_p6, %p828_p3 }
  0x10   :  { %838 = shalt.err (!%p835_p7)
}
  0x11   :  { %s912_s28 = smov 128   ;;  %s913_s29 = smov 8  }
  0x12   :  { %34 = dma.hbm_to_vmem [thread:$0]  %s1027_s1, 1024, %s29_s19, [#allocation6], %s912_s28, %s912_s28, %s913_s29  }
  0x13   :  { %s914_s7 = smov [#allocation2]   ;;  %s915_s9 = smov [#allocation7]  }
  0x14   :  { %s19_s8 = sshll.u32 %s914_s7, 4  ;;  %s42_s10 = sshll.u32 %s915_s9, 4  ;;  %s20_s8 = int_to_ptr.vmem [resolvable:$true] %s19_s8  ;;  %s43_s10 = int_to_ptr.vmem [resolvable:$true] %s42_s10 }
  0x15   :  { %s839_s13 = scalar_lea.hbm %s1026_s0, 128 }
  0x16   :  { %p840_p8 = scmp.ne.s32.totalorder %s1026_s0, %s839_s13  ;;  %p843_p9 = scmp.lt.u32.totalorder %s839_s13, %s1026_s0 }
  0x18   :  { %p845_p10 = pnand %p843_p9, %p840_p8 }
  0x1a   :  { %848 = shalt.err (!%p845_p10)
}
  0x1b   :  { %s849_s1 = scalar_lea.vmem %s20_s8, 128  ;;  %p854_p12 = scmp.lt.s32.totalorder %s20_s8, %s20_s8 }
  0x1c   :  { %p850_p11 = scmp.ne.s32.totalorder %s20_s8, %s849_s1  ;;  %p855_p13 = scmp.lt.s32.totalorder %s849_s1, %s849_s1 }
  0x1e   :  { %p856_p0 = por %p855_p13, %p854_p12 }
  0x20   :  { %p857_p1 = pnand %p856_p0, %p850_p11 }
  0x22   :  { %860 = shalt.err (!%p857_p1)
}
  0x23   :  { %22 = dma.hbm_to_vmem [thread:$0]  %s1026_s0, 128, %s20_s8, [#allocation3]  }
  0x24   :  { %s861_s22 = scalar_lea.hbm %s1029_s3, 5120 }
  0x25   :  { %p862_p2 = scmp.ne.s32.totalorder %s1029_s3, %s861_s22  ;;  %p865_p3 = scmp.lt.u32.totalorder %s861_s22, %s1029_s3 }
  0x27   :  { %p867_p4 = pnand %p865_p3, %p862_p2 }
  0x29   :  { %870 = shalt.err (!%p867_p4)
}
  0x2a   :  { %s871_s27 = scalar_lea.vmem %s43_s10, 5120  ;;  %p876_p6 = scmp.lt.s32.totalorder %s43_s10, %s43_s10 }
  0x2b   :  { %p872_p5 = scmp.ne.s32.totalorder %s43_s10, %s871_s27  ;;  %p877_p7 = scmp.lt.s32.totalorder %s871_s27, %s871_s27 }
  0x2d   :  { %p878_p8 = por %p877_p7, %p876_p6 }
  0x2f   :  { %p879_p9 = pnand %p878_p8, %p872_p5 }
  0x31   :  { %882 = shalt.err (!%p879_p9)
}
  0x32   :  { %s916_s0 = smov 1280   ;;  %s917_s28 = smov 80  }
  0x33   :  { %48 = dma.hbm_to_vmem [thread:$0]  %s1029_s3, 5120, %s43_s10, [#allocation6], %s916_s0, %s916_s0, %s917_s28  }
  0x34   :  { %905 = dma.done.wait [#allocation3], 128  }
  0x35   :  { %906 = vsyncadd [#allocation3], 4294967168 }
  0x36   :  { %907 = dma.done.wait [#allocation6], 6144  }
  0x37   :  { %908 = vsyncadd [#allocation6], 4294961152  ;;  %v918_v0 = vmov 0.0|0.0   ;;  %vm919_vm0 = vmmov 0   ;;  %v920_v1 = vmov 0.0   ;;  %v61_v2 = vld [vmem:[#allocation5] sm:$0xff] }
  0x38   :  { %754 = vmatprep.subr.bf16.mxu0 %v918_v0  ;;  %740 = vmatprep.mubr.msk.f32.mxu0 %vm919_vm0, %v920_v1  ;;  %v62_v3 = vld [vmem:[#allocation5 + $0x8] sm:$0xff]  ;;  %v63_v4 = vld [vmem:[#allocation5 + $0x10] sm:$0xff]  ;;  %v64_v6 = vld [vmem:[#allocation5 + $0x18] sm:$0xff]  ;;  %vm72_vm1 = vcmask 261120   ;;  %s921_s12 = smov [#allocation8]  }
  0x39   :  { %760 = vmatprep.subr.bf16.mxu1 %v918_v0  ;;  %751 = vmatprep.mubr.msk.f32.mxu1 %vm919_vm0, %v920_v1  ;;  %v755_v5 = vpack.c.bf16 %v62_v3, %v61_v2  ;;  %v148_v7 = vld [vmem:[#allocation5 + $0x20] sm:$0xff]  ;;  %v149_v8 = vld [vmem:[#allocation5 + $0x28] sm:$0xff]  ;;  %v758_v9 = vpack.c.bf16 %v64_v6, %v63_v4  ;;  %v60_v11 = vld [vmem:[#allocation2] sm:$0xff]  ;;  %s702_s13 = sshll.u32 %s921_s12, 4  ;;  %s703_s13 = int_to_ptr.vmem [resolvable:$true] %s702_s13 }
  0x3a   :  { %v761_v10 = vpack.c.bf16 %v149_v8, %v148_v7  ;;  %v150_v12 = vld [vmem:[#allocation5 + $0x30] sm:$0xff]  ;;  %v151_v13 = vld [vmem:[#allocation5 + $0x38] sm:$0xff]  ;;  %v235_v15 = vld [vmem:[#allocation7 + $0x8] sm:$0xff]  ;;  %s883_s14 = scalar_lea.vmem %s703_s13, 1280  ;;  %p888_p11 = scmp.lt.s32.totalorder %s703_s13, %s703_s13 }
  0x3b   :  { %756 = vmatpush3.bf16.msra.mxu0 %v755_v5  ;;  %v764_v14 = vpack.c.bf16 %v151_v13, %v150_v12  ;;  %v245_v16 = vld [vmem:[#allocation7 + $0x58] sm:$0xff]  ;;  %v247_v19 = vld [vmem:[#allocation7 + $0x68] sm:$0xff]  ;;  %v234_v20 = vld [vmem:[#allocation7] sm:$0xff]  ;;  %p884_p10 = scmp.ne.s32.totalorder %s703_s13, %s883_s14  ;;  %p889_p12 = scmp.lt.s32.totalorder %s883_s14, %s883_s14 }
  0x3c   :  { %757 = vmatprep.subr.bf16.mxu0 %v918_v0  ;;  %762 = vmatpush3.bf16.msra.mxu1 %v761_v10  ;;  %v237_v17 = vld [vmem:[#allocation7 + $0x18] sm:$0xff]  ;;  %v766_v18 = vpack.c.bf16 %v245_v16, %v235_v15  ;;  %v244_v21 = vld [vmem:[#allocation7 + $0x50] sm:$0xff]  ;;  %v712_v24 = vld [vmem:[%s1028_s2] ss:$0 sm:$0xff] }
  0x3d   :  { %763 = vmatprep.subr.bf16.mxu1 %v918_v0  ;;  %v774_v22 = vpack.c.bf16 %v247_v19, %v237_v17  ;;  %v768_v23 = vpack.c.bf16 %v244_v21, %v234_v20  ;;  %v236_v25 = vld [vmem:[#allocation7 + $0x10] sm:$0xff]  ;;  %v246_v26 = vld [vmem:[#allocation7 + $0x60] sm:$0xff]  ;;  %v255_v32 = vld [vmem:[#allocation7 + $0xa8] sm:$0xff]  ;;  %p890_p13 = por %p889_p12, %p888_p11 }
  0x3e   :  { %v776_v30 = vpack.c.bf16 %v246_v26, %v236_v25  ;;  %v265_v33 = vld [vmem:[#allocation7 + $0xf8] sm:$0xff]  ;;  %v267_v36 = vld [vmem:[#allocation7 + $0x108] sm:$0xff]  ;;  %v254_v37 = vld [vmem:[#allocation7 + $0xa0] sm:$0xff] }
  0x3f   :  { %759 = vmatpush3.bf16.msra.mxu0 %v758_v9  ;;  %v257_v34 = vld [vmem:[#allocation7 + $0xb8] sm:$0xff]  ;;  %v770_v35 = vpack.c.bf16 %v265_v33, %v255_v32  ;;  %v264_v38 = vld [vmem:[#allocation7 + $0xf0] sm:$0xff]  ;;  %v266_v42 = vld [vmem:[#allocation7 + $0x100] sm:$0xff]  ;;  %p891_p0 = pnand %p890_p13, %p884_p10 }
  0x40   :  { %765 = vmatpush3.bf16.msra.mxu1 %v764_v14  ;;  %767 = vmatprep.subr.bf16.mxu0 %v766_v18  ;;  %v778_v39 = vpack.c.bf16 %v267_v36, %v257_v34  ;;  %v772_v40 = vpack.c.bf16 %v264_v38, %v254_v37  ;;  %v256_v41 = vld [vmem:[#allocation7 + $0xb0] sm:$0xff]  ;;  %v239_v44 = vld [vmem:[#allocation7 + $0x28] sm:$0xff]  ;;  %v249_v45 = vld [vmem:[#allocation7 + $0x78] sm:$0xff] }
  0x41   :  { %775 = vmatprep.subr.bf16.mxu1 %v774_v22  ;;  %v780_v43 = vpack.c.bf16 %v266_v42, %v256_v41  ;;  %v241_v46 = vld [vmem:[#allocation7 + $0x38] sm:$0xff]  ;;  %v782_v47 = vpack.c.bf16 %v249_v45, %v239_v44  ;;  %v251_v48 = vld [vmem:[#allocation7 + $0x88] sm:$0xff]  ;;  %v238_v51 = vld [vmem:[#allocation7 + $0x20] sm:$0xff]  ;;  %v278_v22 = vlaneseq }
  0x42   :  { %741 = vmatmul.mubr.msk.f32.vlgmr.msra.gmra.mrb[0].mxu0 %vm72_vm1, %v60_v11  ;;  %v790_v49 = vpack.c.bf16 %v251_v48, %v241_v46  ;;  %v715_v50 = vld [vmem:[%s1028_s2 + $0x1] ss:$0 sm:$0xff]  ;;  %v248_v52 = vld [vmem:[#allocation7 + $0x70] sm:$0xff]  ;;  %v250_v54 = vld [vmem:[#allocation7 + $0x80] sm:$0xff] }
  0x43   :  { %395 = vmatprep.mubr.f32.mxu0 %v920_v1  ;;  %769 = vmatpush1.bf16.msra.mxu0 %v768_v23  ;;  %v240_v53 = vld [vmem:[#allocation7 + $0x30] sm:$0xff]  ;;  %v259_v55 = vld [vmem:[#allocation7 + $0xc8] sm:$0xff]  ;;  %v269_v57 = vld [vmem:[#allocation7 + $0x118] sm:$0xff]  ;;  %v784_v62 = vpack.c.bf16 %v248_v52, %v238_v51  ;;  %v279_v23 = vshrl.u32 %v278_v22, 7 }
  0x44   :  { %771 = vmatprep.subr.bf16.mxu0 %v770_v35  ;;  %v261_v58 = vld [vmem:[#allocation7 + $0xd8] sm:$0xff]  ;;  %v271_v59 = vld [vmem:[#allocation7 + $0x128] sm:$0xff]  ;;  %v792_v63 = vpack.c.bf16 %v250_v54, %v240_v53  ;;  %v258_v0 = vld [vmem:[#allocation7 + $0xc0] sm:$0xff]  ;;  %v786_v3 = vpack.c.bf16 %v269_v57, %v259_v55 }
  0x45   :  { %v794_v4 = vpack.c.bf16 %v271_v59, %v261_v58  ;;  %v268_v5 = vld [vmem:[#allocation7 + $0x110] sm:$0xff]  ;;  %v270_v7 = vld [vmem:[#allocation7 + $0x120] sm:$0xff]  ;;  %v243_v8 = vld [vmem:[#allocation7 + $0x48] sm:$0xff]  ;;  %v288_v25 = vsub.s32 2, %v279_v23  ;;  %v296_v38 = vsub.s32 4, %v279_v23  ;;  %v300_v42 = vsub.s32 5, %v279_v23 }
  0x46   :  { %v260_v6 = vld [vmem:[#allocation7 + $0xd0] sm:$0xff]  ;;  %v253_v9 = vld [vmem:[#allocation7 + $0x98] sm:$0xff]  ;;  %v788_v10 = vpack.c.bf16 %v268_v5, %v258_v0  ;;  %v242_v13 = vld [vmem:[#allocation7 + $0x40] sm:$0xff] }
  0x47   :  { %773 = vmatpush1.bf16.msra.mxu0 %v772_v40  ;;  %v796_v11 = vpack.c.bf16 %v270_v7, %v260_v6  ;;  %v798_v12 = vpack.c.bf16 %v253_v9, %v243_v8  ;;  %v252_v14 = vld [vmem:[#allocation7 + $0x90] sm:$0xff]  ;;  %v263_v15 = vld [vmem:[#allocation7 + $0xe8] sm:$0xff]  ;;  %v273_v16 = vld [vmem:[#allocation7 + $0x138] sm:$0xff] }
  0x48   :  { %783 = vmatprep.subr.bf16.mxu0 %v782_v47  ;;  %v800_v17 = vpack.c.bf16 %v252_v14, %v242_v13  ;;  %v802_v18 = vpack.c.bf16 %v273_v16, %v263_v15  ;;  %v262_v19 = vld [vmem:[#allocation7 + $0xe0] sm:$0xff]  ;;  %v272_v20 = vld [vmem:[#allocation7 + $0x130] sm:$0xff]  ;;  %v274_v26 = vld [vmem:[%s1030_s4] sm:$0xff] }
  0x49   :  { %v804_v21 = vpack.c.bf16 %v272_v20, %v262_v19  ;;  %v297_v44 = vrot.slane %v274_v26, %v296_v38  ;;  %v301_v46 = vrot.slane %v274_v26, %v300_v42 }
 0x115   :  { %v142_v27 = vpop.f32.mrb[0].mxu0 }
 0x116   :  { %v143_v28 = vadd.f32 %v712_v24, %v142_v27  ;;  %v742_v29 = vpop.f32.mrb[1].mxu0  ;;  %v280_v24 = vsub.s32 0, %v279_v23  ;;  %v284_v27 = vsub.s32 1, %v279_v23 }
 0x118   :  { %v146_v31 = vmax.f32 %v143_v28, 0.0  ;;  %v292_v28 = vsub.s32 3, %v279_v23  ;;  %v281_v29 = vrot.slane %v274_v26, %v280_v24 }
 0x11a   :  { %752 = vmatmul.mubr.msk.f32.vlgmr.msra.gmra.mrb[0].mxu1 %vm72_vm1, %v146_v31  ;;  %v285_v31 = vrot.slane %v274_v26, %v284_v27  ;;  %v293_v32 = vrot.slane %v274_v26, %v292_v28 }
 0x11b   :  { %777 = vmatpush1.bf16.msra.mxu1 %v776_v30  ;;  %466 = vmatprep.mubr.f32.mxu1 %v920_v1  ;;  %v289_v30 = vrot.slane %v274_v26, %v288_v25 }
 0x11c   :  { %779 = vmatprep.subr.bf16.mxu1 %v778_v39  ;;  %v304_v39 = vsub.s32 6, %v279_v23 }
 0x11e   :  { %v305_v45 = vrot.slane %v274_v26, %v304_v39 }
 0x11f   :  { %781 = vmatpush1.bf16.msra.mxu1 %v780_v43  ;;  %v308_v43 = vsub.s32 7, %v279_v23 }
 0x120   :  { %791 = vmatprep.subr.bf16.mxu1 %v790_v49 }
 0x121   :  { %v309_v47 = vrot.slane %v274_v26, %v308_v43 }
 0x1ed   :  { %v229_v56 = vpop.f32.mrb[0].mxu1 }
 0x1ee   :  { %v230_v60 = vadd.f32 %v715_v50, %v229_v56  ;;  %v753_v61 = vpop.f32.mrb[1].mxu1  ;;  %v275_v56 = vld [vmem:[%s1030_s4 + $0x8] sm:$0x3] }
 0x1ef   :  { %v313_v57 = vrot.slane %v275_v56, %v280_v24  ;;  %v317_v58 = vrot.slane %v275_v56, %v284_v27 }
 0x1f0   :  { %v233_v2 = vmax.f32 %v230_v60, 0.0 }
 0x1f2   :  { %717 = vmatmul.mubr.msk.f32.vlgmr.msra.gmra.mrb[2].mxu0 %vm72_vm1, %v233_v2  ;;  %718 = vmatmul.mubr.msk.f32.vlgmr.msra.gmra.mrb[2].mxu1 %vm72_vm1, %v233_v2 }
 0x1f3   :  { %785 = vmatpush1.bf16.msra.mxu0 %v784_v62  ;;  %793 = vmatpush1.bf16.msra.mxu1 %v792_v63 }
 0x1f4   :  { %787 = vmatprep.subr.bf16.mxu0 %v786_v3  ;;  %795 = vmatprep.subr.bf16.mxu1 %v794_v4 }
 0x1f5   :  { %537 = vmatprep.mubr.f32.mxu0 %v920_v1  ;;  %608 = vmatprep.mubr.f32.mxu1 %v920_v1 }
 0x1f7   :  { %789 = vmatpush1.bf16.msra.mxu0 %v788_v10  ;;  %797 = vmatpush1.bf16.msra.mxu1 %v796_v11 }
 0x1f8   :  { %799 = vmatprep.subr.bf16.mxu0 %v798_v12 }
 0x1fa   :  { %719 = vmatmul.mubr.msk.f32.vlgmr.msra.gmra.mrb[4].mxu0 %vm72_vm1, %v233_v2  ;;  %720 = vmatmul.mubr.msk.f32.vlgmr.msra.gmra.mrb[4].mxu1 %vm72_vm1, %v233_v2 }
 0x1fb   :  { %801 = vmatpush1.bf16.msra.mxu0 %v800_v17  ;;  %679 = vmatprep.mubr.f32.mxu0 %v920_v1 }
 0x1fc   :  { %803 = vmatprep.subr.bf16.mxu0 %v802_v18 }
 0x1ff   :  { %805 = vmatpush1.bf16.msra.mxu0 %v804_v21 }
 0x202   :  { %721 = vmatmul.mubr.msk.f32.vlgmr.msra.gmra.mrb[6].mxu0 %vm72_vm1, %v233_v2 }
 0x2c5   :  { %v397_v33 = vpop.f32.mrb[2].mxu0  ;;  %v468_v1 = vpop.f32.mrb[2].mxu1 }
 0x2c6   :  { %v398_v34 = vadd.f32 %v397_v33, %v281_v29  ;;  %v469_v35 = vadd.f32 %v468_v1, %v289_v30  ;;  %v399_v36 = vpop.f32.mrb[3].mxu0  ;;  %v470_v37 = vpop.f32.mrb[3].mxu1 }
 0x2c7   :  { %v400_v40 = vadd.f32 %v399_v36, %v285_v31  ;;  %v471_v41 = vadd.f32 %v470_v37, %v293_v32 }
 0x2c8   :  { %686 = vst [vmem:[#allocation8] sm:$0xff] %v398_v34  ;;  %688 = vst [vmem:[#allocation8 + $0x10] sm:$0xff] %v469_v35 }
 0x2c9   :  { %687 = vst [vmem:[#allocation8 + $0x8] sm:$0xff] %v400_v40  ;;  %689 = vst [vmem:[#allocation8 + $0x18] sm:$0xff] %v471_v41 }
 0x2cd   :  { %v539_v48 = vpop.f32.mrb[4].mxu0  ;;  %v610_v49 = vpop.f32.mrb[4].mxu1 }
 0x2ce   :  { %v540_v50 = vadd.f32 %v539_v48, %v297_v44  ;;  %v611_v51 = vadd.f32 %v610_v49, %v305_v45  ;;  %v541_v52 = vpop.f32.mrb[5].mxu0  ;;  %v612_v53 = vpop.f32.mrb[5].mxu1 }
 0x2cf   :  { %v542_v54 = vadd.f32 %v541_v52, %v301_v46  ;;  %v613_v55 = vadd.f32 %v612_v53, %v309_v47 }
 0x2d0   :  { %690 = vst [vmem:[#allocation8 + $0x20] sm:$0xff] %v540_v50  ;;  %692 = vst [vmem:[#allocation8 + $0x30] sm:$0xff] %v611_v51 }
 0x2d1   :  { %691 = vst [vmem:[#allocation8 + $0x28] sm:$0xff] %v542_v54  ;;  %693 = vst [vmem:[#allocation8 + $0x38] sm:$0xff] %v613_v55 }
 0x2d5   :  { %v681_v59 = vpop.f32.mrb[6].mxu0 }
 0x2d6   :  { %v682_v60 = vadd.f32 %v681_v59, %v313_v57  ;;  %v683_v61 = vpop.f32.mrb[7].mxu0 }
 0x2d7   :  { %v684_v62 = vadd.f32 %v683_v61, %v317_v58 }
 0x2d8   :  { %694 = vst [vmem:[#allocation8 + $0x40] sm:$0xff] %v682_v60 }
 0x2d9   :  { %695 = vst [vmem:[#allocation8 + $0x48] sm:$0xff] %v684_v62 }
 0x2da   :  { %894 = shalt.err (!%p891_p0)
}
 0x2db   :  { %s895_s16 = scalar_lea.hbm %s1031_s5, 1280 }
 0x2dc   :  { %p896_p1 = scmp.ne.s32.totalorder %s1031_s5, %s895_s16  ;;  %p899_p2 = scmp.lt.u32.totalorder %s895_s16, %s1031_s5 }
 0x2de   :  { %p901_p3 = pnand %p899_p2, %p896_p1 }
 0x2e0   :  { %904 = shalt.err (!%p901_p3)
}
 0x2e1   :  { %705 = dma.vmem_to_hbm [thread:$0]  %s703_s13, 1280, %s1031_s5, [#allocation4]  }
 0x2e2   :  { %909 = dma.done.wait [#allocation4], 1280  }
 0x2e3   :  { %910 = vsyncadd [#allocation4], 4294966016 }
 0x2e4   :  { %709 = vsyncpa [#allocation3], 1 }
 0x2e5   :  { %710 = vsyncpa [#allocation6], 1 }
 0x2e6   :  { %711 = vsyncpa [#allocation4], 1 }

</bundles_post_ra>
